<compile_context>
chip_gen: v7x
topology: tpu7x:2x2x1
jax: 0.10.0
libtpu: 0.0.40
codegen_flags: <defaults>
</compile_context>

<pallas_src>
import jax
import jax.numpy as jnp
from jax.experimental import pallas as pl
from jax.experimental.pallas import tpu as pltpu


def _avg_mlp_kernel(x_ref, w_ref, b_ref, o_ref):
    # x_ref : (TB, N*D)    one contiguous VMEM tile; prev-watch slices are lane-aligned
    # w_ref : (D_in, D_out) pre-transposed weight, VMEM-resident across grid steps
    # b_ref : (1, D_out)
    # o_ref : (TB, D_out)
    nd = x_ref.shape[1]
    d_in = w_ref.shape[0]
    n = nd // d_in

    # Sum the N prev-watch slices in f32 (static unroll; slices sit on 128-lane tile
    # boundaries so no VMEM copies are materialized).
    acc = x_ref[:, 0:d_in].astype(jnp.float32)
    for i in range(1, n):
        acc = acc + x_ref[:, i * d_in:(i + 1) * d_in].astype(jnp.float32)
    acc = acc * (1.0 / n)  # mean: in-kernel VPU mul, hides under MXU/DMA

    # (TB, D_in) @ (D_in, D_out) with f32 accumulation on the MXU.
    y = jnp.dot(acc, w_ref[...], preferred_element_type=jnp.float32)
    o_ref[...] = (y + b_ref[...]).astype(o_ref.dtype)


def _pick_batch_tile(b: int, row_bytes: int) -> int:
    # Small batch: full-extent block (bypasses the (8,128) divisibility rule).
    if b <= 8:
        return b
    # Target ~2 MiB of x per grid step (mem-bound kernels only reach ~85%+ of HBM
    # roofline at >=1-2 MiB tiles); keep it a multiple of 8 sublanes.
    tb = max(8, ((2 << 20) // row_bytes) // 8 * 8)
    # Keep at least 2 grid steps so v7x's two TensorCores both get work and the DMA
    # pipeline always has a next tile to prefetch (v5e/v6e: pipelining depth only).
    half = ((-(-b // 2)) + 7) // 8 * 8
    tb = min(tb, half)
    # Never exceed B rounded up to a sublane multiple (partial last block is masked).
    tb = min(tb, (b + 7) // 8 * 8)
    return max(tb, 8)


def simple_avg_model(x, weight, bias):
    """x: (B, N, D); weight: (D_out, D_in) torch layout; bias: (D_out,)."""
    B, N, D = x.shape
    D_out, D_in = weight.shape
    assert D_in == D

    # Free, layout-preserving reshape for a contiguous (B, N, D) input: each batch row
    # becomes one N*D lane stripe -> one dense DMA per tile, no HBM transpose copy.
    x2 = x.reshape(B, N * D)

    # Persistent-constant style prep (tiny, 64 KiB): weight as (D_in, D_out), bias 2-D.
    w_t = jnp.transpose(weight)      # (D_in, D_out)
    b2 = bias.reshape(1, D_out)

    TB = _pick_batch_tile(B, N * D * x.dtype.itemsize)
    grid = (pl.cdiv(B, TB),)

    itemsize = x.dtype.itemsize
    cost = pl.CostEstimate(
        flops=2 * B * D * D_out + B * N * D,
        transcendentals=0,
        bytes_accessed=(B * N * D + D * D_out + D_out + B * D_out) * itemsize,
    )

    return pl.pallas_call(
        _avg_mlp_kernel,
        out_shape=jax.ShapeDtypeStruct((B, D_out), x.dtype),
        grid_spec=pltpu.PrefetchScalarGridSpec(
            num_scalar_prefetch=0,
            grid=grid,
            in_specs=[
                # x tile: (TB, N*D), marches along batch.
                pl.BlockSpec((TB, N * D), lambda i: (i, 0)),
                # weight / bias: constant index_map -> VMEM-resident across tiles.
                pl.BlockSpec((D, D_out), lambda i: (0, 0)),
                pl.BlockSpec((1, D_out), lambda i: (0, 0)),
            ],
            out_specs=pl.BlockSpec((TB, D_out), lambda i: (i, 0)),
        ),
        compiler_params=pltpu.CompilerParams(
            dimension_semantics=("parallel",),
        ),
        cost_estimate=cost,
    )(x2, w_t, b2)


def _reference(x, weight, bias):
    xm = jnp.mean(x, axis=1)
    return xm @ weight.T + bias


if __name__ == "__main__":
    # Small shapes consistent with the module: batch=8, num_prev_watch=4, embed_dim=128.
    B, N, D = 8, 4, 128
    key = jax.random.PRNGKey(0)
    kx, kw, kb = jax.random.split(key, 3)

    x = jax.random.normal(kx, (B, N, D), dtype=jnp.float32)
    # Torch Linear parameter shapes: weight (out, in), bias (out,).
    bound = 1.0 / (D ** 0.5)
    weight = jax.random.uniform(kw, (D, D), minval=-bound, maxval=bound, dtype=jnp.float32)
    bias = jax.random.uniform(kb, (D,), minval=-bound, maxval=bound, dtype=jnp.float32)

    fn = jax.jit(simple_avg_model)
    out = jax.block_until_ready(fn(x, weight, bias))

    ref = _reference(x, weight, bias)
    assert out.shape == (B, D)
    assert jnp.allclose(out, ref, atol=1e-5, rtol=1e-5), "mismatch vs reference"

    print("KERNEL_OK")
</pallas_src>

<mosaic_0001>
module attributes {stable_mosaic.version = 11 : i64} {
  func.func @_avg_mlp_kernel(%arg0: i32, %arg1: memref<8x512xf32, #tpu.memory_space<vmem>>, %arg2: memref<128x128xf32, #tpu.memory_space<vmem>>, %arg3: memref<1x128xf32, #tpu.memory_space<vmem>>, %arg4: memref<8x128xf32, #tpu.memory_space<vmem>>) attributes {dimension_semantics = [#tpu.dimension_semantics<parallel>], iteration_bounds = array<i64: 1>, scalar_prefetch = 0 : i64, scratch_operands = 0 : i64, tpu.core_type = #tpu.core_type<tc>, window_params = [{transform_indices = @transform_0, window_bounds = array<i64: 8, 512>}, {pipeline_mode = #tpu.pipeline_mode<synchronous>, transform_indices = @transform_1, window_bounds = array<i64: 128, 128>}, {pipeline_mode = #tpu.pipeline_mode<synchronous>, transform_indices = @transform_2, window_bounds = array<i64: 1, 128>}, {transform_indices = @transform_3, window_bounds = array<i64: 8, 128>}]} {
    %c0 = arith.constant 0 : index
    %c0_0 = arith.constant 0 : index
    %0 = vector.load %arg1[%c0, %c0_0] : memref<8x512xf32, #tpu.memory_space<vmem>>, vector<8x128xf32>
    %c0_1 = arith.constant 0 : index
    %c128 = arith.constant 128 : index
    %1 = vector.load %arg1[%c0_1, %c128] : memref<8x512xf32, #tpu.memory_space<vmem>>, vector<8x128xf32>
    %2 = arith.addf %0, %1 : vector<8x128xf32>
    %c0_2 = arith.constant 0 : index
    %c256 = arith.constant 256 : index
    %3 = vector.load %arg1[%c0_2, %c256] : memref<8x512xf32, #tpu.memory_space<vmem>>, vector<8x128xf32>
    %4 = arith.addf %2, %3 : vector<8x128xf32>
    %c0_3 = arith.constant 0 : index
    %c384 = arith.constant 384 : index
    %5 = vector.load %arg1[%c0_3, %c384] : memref<8x512xf32, #tpu.memory_space<vmem>>, vector<8x128xf32>
    %6 = arith.addf %4, %5 : vector<8x128xf32>
    %cst = arith.constant 2.500000e-01 : f32
    %7 = vector.broadcast %cst : f32 to vector<8x128xf32>
    %8 = arith.mulf %6, %7 : vector<8x128xf32>
    %c0_4 = arith.constant 0 : index
    %c0_5 = arith.constant 0 : index
    %9 = vector.load %arg2[%c0_4, %c0_5] : memref<128x128xf32, #tpu.memory_space<vmem>>, vector<128x128xf32>
    %cst_6 = arith.constant dense<0.000000e+00> : vector<8x128xf32>
    %10 = tpu.matmul %8, %9, %cst_6 {dimension_numbers = #tpu.dot_dimension_numbers<[1], [0], [0], [1], [0, 0, 1, 1], [], []>} : vector<8x128xf32>, vector<128x128xf32>, vector<8x128xf32> -> vector<8x128xf32>
    %c0_7 = arith.constant 0 : index
    %c0_8 = arith.constant 0 : index
    %11 = vector.load %arg3[%c0_7, %c0_8] : memref<1x128xf32, #tpu.memory_space<vmem>>, vector<1x128xf32>
    %12 = vector.broadcast %11 : vector<1x128xf32> to vector<8x128xf32>
    %13 = arith.addf %10, %12 : vector<8x128xf32>
    %c0_9 = arith.constant 0 : index
    %c0_10 = arith.constant 0 : index
    %14 = vector.load %arg4[%c0_9, %c0_10] : memref<8x128xf32, #tpu.memory_space<vmem>>, vector<8x128xf32>
    tpu.vector_store %arg4[%c0_9, %c0_10], %13 {strides = array<i32>} : memref<8x128xf32, #tpu.memory_space<vmem>>, vector<8x128xf32>,
    return
  }
  func.func @transform_0(%arg0: i32) -> (i32, i32) {
    %c0_i32 = arith.constant 0 : i32
    %c0_i32_0 = arith.constant 0 : i32
    return %arg0, %c0_i32 : i32, i32
  }
  func.func @transform_1(%arg0: i32) -> (i32, i32) {
    %c0_i32 = arith.constant 0 : i32
    %c0_i32_0 = arith.constant 0 : i32
    %c0_i32_1 = arith.constant 0 : i32
    return %c0_i32, %c0_i32_0 : i32, i32
  }
  func.func @transform_2(%arg0: i32) -> (i32, i32) {
    %c0_i32 = arith.constant 0 : i32
    %c0_i32_0 = arith.constant 0 : i32
    %c0_i32_1 = arith.constant 0 : i32
    return %c0_i32, %c0_i32_0 : i32, i32
  }
  func.func @transform_3(%arg0: i32) -> (i32, i32) {
    %c0_i32 = arith.constant 0 : i32
    %c0_i32_0 = arith.constant 0 : i32
    return %arg0, %c0_i32 : i32, i32
  }
}

</mosaic_0001>

<bundles_post_ra>
// kernel: simple_avg_model.1
= control target key start
LH: loop header
LB: loop body
LE: loop exit
PB: predicated region body
PF: predicated region fallthrough
CT: control target
= control target key end

     0   :  { %v236_v3 = vmov 0.0|0.0   ;;  %vm237_vm0 = vmmov 0   ;;  %v238_v6 = vmov 0.0   ;;  %s335_s0 = inlined_call_operand.vmem [shape: f32[8,512], index: 0, kind: input, shape index: {}]   ;;  %s336_s1 = inlined_call_operand.vmem [shape: f32[128,128], index: 1, kind: input, shape index: {}]   ;;  %s337_s2 = inlined_call_operand.vmem [shape: f32[1,128], index: 2, kind: input, shape index: {}]   ;;  %s338_s3 = inlined_call_operand.hbm [shape: f32[8,128], index: 3, kind: output, shape index: {}]  }
   0x1   :  { %v23_v0 = vld [vmem:[%s336_s1] sm:$0xff]  ;;  %v24_v1 = vld [vmem:[%s336_s1 + $0x8] sm:$0xff]  ;;  %v25_v2 = vld [vmem:[%s336_s1 + $0x10] sm:$0xff]  ;;  %184 = vmatprep.subr.bf16.mxu0 %v236_v3  ;;  %181 = vmatprep.mubr.msk.f32.mxu0 %vm237_vm0, %v238_v6 }
   0x2   :  { %v185_v4 = vpack.c.bf16 %v24_v1, %v23_v0  ;;  %v26_v5 = vld [vmem:[%s336_s1 + $0x18] sm:$0xff]  ;;  %v27_v8 = vld [vmem:[%s336_s1 + $0x20] sm:$0xff]  ;;  %v28_v9 = vld [vmem:[%s336_s1 + $0x28] sm:$0xff] }
   0x3   :  { %v188_v7 = vpack.c.bf16 %v26_v5, %v25_v2  ;;  %v191_v10 = vpack.c.bf16 %v28_v9, %v27_v8 }
   0x4   :  { %186 = vmatpush3.bf16.msra.mxu0 %v185_v4 }
   0x5   :  { %187 = vmatprep.subr.bf16.mxu0 %v236_v3 }
   0x8   :  { %189 = vmatpush3.bf16.msra.mxu0 %v188_v7 }
   0x9   :  { %8 = vsyncpa [#allocation3], 0  ;;  %190 = vmatprep.subr.bf16.mxu0 %v236_v3  ;;  %v29_v11 = vld [vmem:[%s336_s1 + $0x30] sm:$0xff]  ;;  %v30_v12 = vld [vmem:[%s336_s1 + $0x38] sm:$0xff] }
   0xa   :  { %v194_v13 = vpack.c.bf16 %v30_v12, %v29_v11  ;;  %v31_v14 = vld [vmem:[%s336_s1 + $0x40] sm:$0xff]  ;;  %v32_v15 = vld [vmem:[%s336_s1 + $0x48] sm:$0xff]  ;;  %v33_v19 = vld [vmem:[%s336_s1 + $0x50] sm:$0xff] }
   0xb   :  { %v197_v16 = vpack.c.bf16 %v32_v15, %v31_v14  ;;  %v15_v17 = vld [vmem:[%s335_s0] sm:$0xff]  ;;  %v16_v18 = vld [vmem:[%s335_s0 + $0x8] sm:$0xff]  ;;  %v34_v20 = vld [vmem:[%s336_s1 + $0x58] sm:$0xff] }
   0xc   :  { %192 = vmatpush3.bf16.msra.mxu0 %v191_v10  ;;  %v17_v21 = vadd.f32 %v16_v18, %v15_v17  ;;  %v200_v22 = vpack.c.bf16 %v34_v20, %v33_v19  ;;  %v18_v23 = vld [vmem:[%s335_s0 + $0x10] sm:$0xff]  ;;  %v35_v24 = vld [vmem:[%s336_s1 + $0x60] sm:$0xff]  ;;  %v36_v25 = vld [vmem:[%s336_s1 + $0x68] sm:$0xff] }
   0xd   :  { %193 = vmatprep.subr.bf16.mxu0 %v236_v3  ;;  %v203_v27 = vpack.c.bf16 %v36_v25, %v35_v24  ;;  %v20_v28 = vld [vmem:[%s335_s0 + $0x18] sm:$0xff]  ;;  %v37_v29 = vld [vmem:[%s336_s1 + $0x70] sm:$0xff]  ;;  %v131_v34 = vld [vmem:[%s337_s2] ss:$0 sm:$0xff]  ;;  %s239_s0 = smov [#allocation2]  }
   0xe   :  { %v19_v26 = vadd.f32 %v18_v23, %v17_v21  ;;  %v38_v30 = vld [vmem:[%s336_s1 + $0x78] sm:$0xff]  ;;  %s123_s27 = sshll.u32 %s239_s0, 4  ;;  %s124_s27 = int_to_ptr.vmem [resolvable:$true] %s123_s27 }
   0xf   :  { %v206_v32 = vpack.c.bf16 %v38_v30, %v37_v29  ;;  %s212_s28 = scalar_lea.vmem %s124_s27, 128  ;;  %p217_p1 = scmp.lt.s32.totalorder %s124_s27, %s124_s27 }
  0x10   :  { %195 = vmatpush3.bf16.msra.mxu0 %v194_v13  ;;  %v21_v31 = vadd.f32 %v20_v28, %v19_v26  ;;  %p213_p0 = scmp.ne.s32.totalorder %s124_s27, %s212_s28  ;;  %p218_p2 = scmp.lt.s32.totalorder %s212_s28, %s212_s28 }
  0x11   :  { %196 = vmatprep.subr.bf16.mxu0 %v236_v3 }
  0x12   :  { %v22_v33 = vmul.f32 0.25, %v21_v31  ;;  %p219_p3 = por %p218_p2, %p217_p1 }
  0x14   :  { %198 = vmatpush3.bf16.msra.mxu0 %v197_v16  ;;  %p220_p4 = pnand %p219_p3, %p213_p0 }
  0x15   :  { %199 = vmatprep.subr.bf16.mxu0 %v236_v3 }
  0x18   :  { %201 = vmatpush3.bf16.msra.mxu0 %v200_v22 }
  0x19   :  { %202 = vmatprep.subr.bf16.mxu0 %v236_v3 }
  0x1c   :  { %204 = vmatpush3.bf16.msra.mxu0 %v203_v27 }
  0x1d   :  { %205 = vmatprep.subr.bf16.mxu0 %v236_v3 }
  0x20   :  { %207 = vmatpush3.bf16.msra.mxu0 %v206_v32 }
  0x23   :  { %182 = vmatmul.mubr.f32.vlgmr.msra.gmra.mrb[0].mxu0 %v22_v33 }
  0xf6   :  { %v112_v35 = vpop.f32.mrb[0].mxu0 }
  0xf7   :  { %v113_v36 = vadd.f32 %v131_v34, %v112_v35  ;;  %v183_v37 = vpop.f32.mrb[1].mxu0 }
  0xf9   :  { %116 = vst [vmem:[#allocation2] sm:$0xff] %v113_v36 }
  0xfa   :  { %223 = shalt.err (!%p220_p4)
}
  0xfb   :  { %s224_s30 = scalar_lea.hbm %s338_s3, 128 }
  0xfc   :  { %p225_p5 = scmp.ne.s32.totalorder %s338_s3, %s224_s30  ;;  %p228_p6 = scmp.lt.u32.totalorder %s224_s30, %s338_s3 }
  0xfe   :  { %p230_p7 = pnand %p228_p6, %p225_p5 }
 0x100   :  { %233 = shalt.err (!%p230_p7)
}
 0x101   :  { %126 = dma.vmem_to_hbm [thread:$0]  %s124_s27, 128, %s338_s3, [#allocation3]  }
 0x102   :  { %234 = dma.done.wait [#allocation3], 128  }
 0x103   :  { %235 = vsyncadd [#allocation3], 4294967168 }
 0x104   :  { %130 = vsyncpa [#allocation3], 1 }

</bundles_post_ra>
